<compile_context>
chip_gen: v7x
topology: tpu7x:2x2x1
jax: 0.10.0
libtpu: 0.0.40
codegen_flags: <defaults>
</compile_context>

<pallas_src>
import jax
import jax.numpy as jnp
from jax.experimental import pallas as pl
from jax.experimental.pallas import tpu as pltpu

LANE = 128  # lane-dense parameter/output width (Dout=16 lives in lanes 0..15)


def linear_relu_kernel(x_ref, wb_ref, o_ref):
    # x_ref : SMEM (Din,)          -- activation scalars
    # wb_ref: VMEM (Din+1, LANE)   -- rows 0..Din-1 = weight.T (lane-padded),
    #                                 row Din = bias (lane-padded)
    # o_ref : VMEM (1, LANE)       -- lane-dense output row
    din = wb_ref.shape[0] - 1
    acc = wb_ref[pl.ds(din, 1), :]                 # start from the bias row
    for k in range(din):                           # Din=3: static unroll
        acc = acc + x_ref[k] * wb_ref[pl.ds(k, 1), :]
    o_ref[...] = jnp.maximum(acc, 0.0).astype(o_ref.dtype)


def pack_params(w_out_in, bias, lane=LANE):
    """Fuse PyTorch-layout (Dout, Din) weight + (Dout,) bias into one lane-dense
    (Din+1, lane) slab: rows 0..Din-1 = weight.T, row Din = bias, lanes >= Dout
    zero-padded (a one-time parameter-layout choice, no runtime transpose)."""
    dout, din = w_out_in.shape
    wb = jnp.zeros((din + 1, lane), dtype=jnp.float32)
    wb = wb.at[:din, :dout].set(w_out_in.T.astype(jnp.float32))
    wb = wb.at[din, :dout].set(bias.astype(jnp.float32))
    return wb


def linear_relu(x, wb, dout):
    """x: (1, Din) f32; wb: (Din+1, LANE) fused weight.T + bias slab."""
    B, Din = x.shape
    assert B == 1, "module forward is a single row; batch>1 would add a grid"
    assert wb.shape == (Din + 1, LANE)
    x1d = x.reshape(Din)  # 1-D SMEM scalars (16 B, not an [8,128] padded block)
    nbytes = 4 * (Din + (Din + 1) * LANE + B * LANE)
    out = pl.pallas_call(
        linear_relu_kernel,
        out_shape=jax.ShapeDtypeStruct((B, LANE), x.dtype),
        in_specs=[
            pl.BlockSpec(memory_space=pltpu.MemorySpace.SMEM),   # x scalars
            pl.BlockSpec(memory_space=pltpu.MemorySpace.VMEM),   # fused W|b slab
        ],
        out_specs=pl.BlockSpec(memory_space=pltpu.MemorySpace.VMEM),
        cost_estimate=pl.CostEstimate(
            flops=2 * B * Din * LANE,
            transcendentals=0,
            bytes_accessed=nbytes,
        ),
    )(x1d, wb)
    return out[:, :dout]  # slice lane padding away outside the kernel


if __name__ == "__main__":
    key = jax.random.PRNGKey(0)
    k_x, k_b, k_w2, k_b2 = jax.random.split(key, 4)

    B, Din, Dout = 1, 3, 16
    x0 = jax.random.normal(k_x, (B, Din), dtype=jnp.float32)

    # nn.Linear(3, 16) params per the module: weight.data.zero_(); bias keeps
    # the default init ~ U(-1/sqrt(Din), 1/sqrt(Din)) (different RNG than torch,
    # numerically equivalent distribution).
    w = jnp.zeros((Dout, Din), dtype=jnp.float32)
    bound = 1.0 / float(Din) ** 0.5
    b = jax.random.uniform(
        k_b, (Dout,), dtype=jnp.float32, minval=-bound, maxval=bound
    )

    out = linear_relu(x0, pack_params(w, b), Dout)
    jax.block_until_ready(out)

    ref = jnp.maximum(x0 @ w.T + b, 0.0)
    assert out.shape == (B, Dout)
    assert jnp.allclose(out, ref, atol=1e-6), "mismatch vs reference (module params)"

    # Sanity check with nonzero weights: the module's zero weight only exercises
    # relu(bias); this validates the x.W FMA path and the (Din, Dout) layout.
    w2 = jax.random.normal(k_w2, (Dout, Din), dtype=jnp.float32)
    b2 = jax.random.normal(k_b2, (Dout,), dtype=jnp.float32)
    out2 = linear_relu(x0, pack_params(w2, b2), Dout)
    jax.block_until_ready(out2)
    ref2 = jnp.maximum(x0 @ w2.T + b2, 0.0)
    assert jnp.allclose(out2, ref2, atol=1e-5), "mismatch vs reference (random params)"

    print("KERNEL_OK")
</pallas_src>

<mosaic_0001>
module attributes {stable_mosaic.version = 11 : i64} {
  func.func @linear_relu_kernel(%arg0: memref<3xf32, #tpu.memory_space<smem>>, %arg1: memref<4x128xf32, #tpu.memory_space<vmem>>, %arg2: memref<1x128xf32, #tpu.memory_space<vmem>>) attributes {dimension_semantics = [], scalar_prefetch = 0 : i64, scratch_operands = 0 : i64, tpu.core_type = #tpu.core_type<tc>} {
    %c3 = arith.constant 3 : index
    %c0 = arith.constant 0 : index
    %0 = vector.load %arg1[%c3, %c0] : memref<4x128xf32, #tpu.memory_space<vmem>>, vector<1x128xf32>
    %c0_0 = arith.constant 0 : index
    %1 = memref.load %arg0[%c0_0] : memref<3xf32, #tpu.memory_space<smem>>
    %c0_1 = arith.constant 0 : index
    %c0_2 = arith.constant 0 : index
    %2 = vector.load %arg1[%c0_1, %c0_2] : memref<4x128xf32, #tpu.memory_space<vmem>>, vector<1x128xf32>
    %3 = vector.broadcast %1 : f32 to vector<1x128xf32>
    %4 = arith.mulf %3, %2 : vector<1x128xf32>
    %5 = arith.addf %0, %4 : vector<1x128xf32>
    %c1 = arith.constant 1 : index
    %6 = memref.load %arg0[%c1] : memref<3xf32, #tpu.memory_space<smem>>
    %c1_3 = arith.constant 1 : index
    %c0_4 = arith.constant 0 : index
    %7 = vector.load %arg1[%c1_3, %c0_4] : memref<4x128xf32, #tpu.memory_space<vmem>>, vector<1x128xf32>
    %8 = vector.broadcast %6 : f32 to vector<1x128xf32>
    %9 = arith.mulf %8, %7 : vector<1x128xf32>
    %10 = arith.addf %5, %9 : vector<1x128xf32>
    %c2 = arith.constant 2 : index
    %11 = memref.load %arg0[%c2] : memref<3xf32, #tpu.memory_space<smem>>
    %c2_5 = arith.constant 2 : index
    %c0_6 = arith.constant 0 : index
    %12 = vector.load %arg1[%c2_5, %c0_6] : memref<4x128xf32, #tpu.memory_space<vmem>>, vector<1x128xf32>
    %13 = vector.broadcast %11 : f32 to vector<1x128xf32>
    %14 = arith.mulf %13, %12 : vector<1x128xf32>
    %15 = arith.addf %10, %14 : vector<1x128xf32>
    %cst = arith.constant 0.000000e+00 : f32
    %16 = vector.broadcast %cst : f32 to vector<1x128xf32>
    %17 = arith.maximumf %15, %16 : vector<1x128xf32>
    %c0_7 = arith.constant 0 : index
    %c0_8 = arith.constant 0 : index
    %18 = vector.load %arg2[%c0_7, %c0_8] : memref<1x128xf32, #tpu.memory_space<vmem>>, vector<1x128xf32>
    tpu.vector_store %arg2[%c0_7, %c0_8], %17 {strides = array<i32>} : memref<1x128xf32, #tpu.memory_space<vmem>>, vector<1x128xf32>,
    return
  }
}

</mosaic_0001>

<bundles_post_ra>
// kernel: tpu_custom_call.1
= control target key start
LH: loop header
LB: loop body
LE: loop exit
PB: predicated region body
PF: predicated region fallthrough
CT: control target
= control target key end

     0   :  { %7 = vsyncpa [#allocation5], 0  ;;  %s188_s0 = inlined_call_operand.hbm [shape: f32[3], index: 0, kind: input, shape index: {}]   ;;  %s189_s1 = inlined_call_operand.hbm [shape: f32[4,128], index: 1, kind: input, shape index: {}]   ;;  %s190_s2 = inlined_call_operand.hbm [shape: f32[1,128], index: 2, kind: output, shape index: {}]  }
   0x1   :  { %8 = vsyncpa [#allocation3], 0 }
   0x2   :  { %9 = vsyncpa [#allocation4], 0  ;;  %s74_s11 = scalar_lea.hbm %s188_s0, 16 }
   0x3   :  { %p75_p0 = scmp.ne.s32.totalorder %s188_s0, %s74_s11  ;;  %p78_p1 = scmp.lt.u32.totalorder %s74_s11, %s188_s0 }
   0x5   :  { %p80_p2 = pnand %p78_p1, %p75_p0 }
   0x7   :  { %83 = shalt.err (!%p80_p2)
}
   0x8   :  { %s134_s16 = smov [#allocation2]   ;;  %s135_s19 = smov [#allocation6]  }
   0x9   :  { %17 = dma.hbm_to_smem %s188_s0, 16, %s134_s16, [#allocation5]  }
   0xa   :  { %s24_s20 = sshll.u32 %s135_s19, 4  ;;  %s84_s23 = scalar_lea.hbm %s189_s1, 64  ;;  %s25_s20 = int_to_ptr.vmem [resolvable:$true] %s24_s20 }
   0xb   :  { %p85_p3 = scmp.ne.s32.totalorder %s189_s1, %s84_s23  ;;  %p88_p4 = scmp.lt.u32.totalorder %s84_s23, %s189_s1 }
   0xd   :  { %p90_p5 = pnand %p88_p4, %p85_p3 }
   0xf   :  { %93 = shalt.err (!%p90_p5)
}
  0x10   :  { %s94_s28 = scalar_lea.vmem %s25_s20, 64  ;;  %p99_p7 = scmp.lt.s32.totalorder %s25_s20, %s25_s20 }
  0x11   :  { %p95_p6 = scmp.ne.s32.totalorder %s25_s20, %s94_s28  ;;  %p100_p8 = scmp.lt.s32.totalorder %s94_s28, %s94_s28 }
  0x13   :  { %p101_p9 = por %p100_p8, %p99_p7 }
  0x15   :  { %p102_p10 = pnand %p101_p9, %p95_p6 }
  0x17   :  { %105 = shalt.err (!%p102_p10)
}
  0x18   :  { %27 = dma.hbm_to_vmem [thread:$0]  %s189_s1, 64, %s25_s20, [#allocation3]  }
  0x19   :  { %128 = dma.done.wait [#allocation5], 16  }
  0x1a   :  { %129 = vsyncadd [#allocation5], 4294967280 }
  0x1b   :  { %130 = dma.done.wait [#allocation3], 64  }
  0x1c   :  { %131 = vsyncadd [#allocation3], 4294967232 }
  0x1d   :  { %34 = sfence }
  0x1e   :  { %s36_s30 = sld [smem:[#allocation2]]  ;;  %s69_s3 = sld [smem:[#allocation2 + $0x1]]  ;;  %v37_v0 = vld [vmem:[#allocation6] sm:$0x1]  ;;  %v42_v1 = vld [vmem:[#allocation6 + $0x1] sm:$0x1] }
  0x1f   :  { %s70_s4 = sld [smem:[#allocation2 + $0x2]]  ;;  %v35_v2 = vld [vmem:[#allocation6 + $0x3] sm:$0x1]  ;;  %v47_v4 = vld [vmem:[#allocation6 + $0x2] sm:$0x1]  ;;  %s136_s1 = smov [#allocation7]  }
  0x20   :  { %s59_s5 = sshll.u32 %s136_s1, 4  ;;  %s60_s5 = int_to_ptr.vmem [resolvable:$true] %s59_s5 }
  0x21   :  { %s106_s6 = scalar_lea.vmem %s60_s5, 16  ;;  %s110_s7 = scalar_lea.vmem %s60_s5, 32 }
  0x22   :  { %p107_p11 = scmp.ne.s32.totalorder %s60_s5, %s106_s6  ;;  %p111_p12 = scmp.lt.s32.totalorder %s60_s5, %s60_s5 }
  0x23   :  { %p112_p13 = scmp.lt.s32.totalorder %s110_s7, %s106_s6 }
  0x24   :  { %v38_v3 = vstv %s36_s30  ;;  %v43_v6 = vstv %s69_s3 }
  0x25   :  { %v39_v5 = vmul.f32 %v38_v3, %v37_v0  ;;  %v48_v7 = vstv %s70_s4  ;;  %v44_v8 = vmul.f32 %v43_v6, %v42_v1  ;;  %p113_p0 = por %p112_p13, %p111_p12 }
  0x26   :  { %v49_v10 = vmul.f32 %v48_v7, %v47_v4 }
  0x27   :  { %v40_v9 = vadd.f32 %v39_v5, %v35_v2  ;;  %p114_p1 = pnand %p113_p0, %p107_p11 }
  0x29   :  { %v45_v11 = vadd.f32 %v44_v8, %v40_v9 }
  0x2b   :  { %v50_v12 = vadd.f32 %v49_v10, %v45_v11 }
  0x2d   :  { %v51_v13 = vmax.f32 %v50_v12, 0.0 }
  0x2f   :  { %52 = vst [vmem:[#allocation7] sm:$0x1] %v51_v13 }
  0x30   :  { %117 = shalt.err (!%p114_p1)
}
  0x31   :  { %s118_s10 = scalar_lea.hbm %s190_s2, 16 }
  0x32   :  { %p119_p2 = scmp.ne.s32.totalorder %s190_s2, %s118_s10  ;;  %p122_p3 = scmp.lt.u32.totalorder %s118_s10, %s190_s2 }
  0x34   :  { %p124_p4 = pnand %p122_p3, %p119_p2 }
  0x36   :  { %127 = shalt.err (!%p124_p4)
}
  0x37   :  { %62 = dma.vmem_to_hbm [thread:$0]  %s60_s5, 16, %s190_s2, [#allocation4]  }
  0x38   :  { %132 = dma.done.wait [#allocation4], 16  }
  0x39   :  { %133 = vsyncadd [#allocation4], 4294967280 }
  0x3a   :  { %66 = vsyncpa [#allocation3], 1 }
  0x3b   :  { %67 = vsyncpa [#allocation4], 1 }
  0x3c   :  { %68 = vsyncpa [#allocation5], 1 }

</bundles_post_ra>
